<compile_context>
chip_gen: v7x
topology: tpu7x:2x2x1
jax: 0.10.0
libtpu: 0.0.40
codegen_flags: <defaults>
</compile_context>

<pallas_src>
import jax
import jax.numpy as jnp
from jax.experimental import pallas as pl
from jax.experimental.pallas import tpu as pltpu


def _identity_copy_kernel(x_ref, o_ref):
    # x_ref / o_ref are raw HBM refs (memory_space=pl.ANY).  One direct
    # HBM->HBM DMA copies the whole tensor; no VMEM staging, no grid.
    def body(sem):
        cp = pltpu.make_async_copy(x_ref, o_ref, sem)
        cp.start()
        cp.wait()

    pl.run_scoped(body, pltpu.SemaphoreType.DMA(()))


def _imodel_forward_impl(x: jax.Array) -> jax.Array:
    itemsize = jnp.dtype(x.dtype).itemsize
    return pl.pallas_call(
        _identity_copy_kernel,
        out_shape=jax.ShapeDtypeStruct(x.shape, x.dtype),
        in_specs=[pl.BlockSpec(memory_space=pl.ANY)],
        out_specs=pl.BlockSpec(memory_space=pl.ANY),
        cost_estimate=pl.CostEstimate(
            flops=0,
            transcendentals=0,
            bytes_accessed=2 * x.size * itemsize,
        ),
    )(x)


_imodel_forward_jit = jax.jit(_imodel_forward_impl)


def imodel_forward(x: jax.Array) -> jax.Array:
    """Pallas implementation of IModel.forward (identity contract)."""
    if x.size == 0:
        # Nothing to copy; empty tensors pass straight through.
        return x
    return _imodel_forward_jit(x)


if __name__ == "__main__":
    key = jax.random.PRNGKey(0)
    # NCHW input consistent with a typical conv-style model contract.
    x = jax.random.normal(key, (2, 4, 16, 16), dtype=jnp.float32)

    y = imodel_forward(x)
    y = jax.block_until_ready(y)

    assert y.shape == x.shape, (y.shape, x.shape)
    assert y.dtype == x.dtype, (y.dtype, x.dtype)
    assert bool(jnp.allclose(y, x)), "identity forward mismatch"

    print("KERNEL_OK")
</pallas_src>

<mosaic_0001>
module attributes {stable_mosaic.version = 11 : i64} {
  func.func @_identity_copy_kernel(%arg0: memref<2x4x16x16xf32, #tpu.memory_space<any>>, %arg1: memref<2x4x16x16xf32, #tpu.memory_space<any>>) attributes {dimension_semantics = [], scalar_prefetch = 0 : i64, scratch_operands = 0 : i64, tpu.core_type = #tpu.core_type<tc>} {
    "tpu.region"() ({
      %0 = tpu.sem_alloc : memref<!tpu.dma_semaphore, #tpu.memory_space<semaphore_mem>>
      tpu.enqueue_dma source(%arg0 : memref<2x4x16x16xf32, #tpu.memory_space<any>>) target(%arg1 : memref<2x4x16x16xf32, #tpu.memory_space<any>>) target_semaphore(%0 : memref<!tpu.dma_semaphore, #tpu.memory_space<semaphore_mem>>)
      tpu.wait_dma2 semaphore(%0 : memref<!tpu.dma_semaphore, #tpu.memory_space<semaphore_mem>>) src(%arg0 : memref<2x4x16x16xf32, #tpu.memory_space<any>>) dst(%arg1 : memref<2x4x16x16xf32, #tpu.memory_space<any>>)
      tpu.yield
    }) : () -> ()
    return
  }
}

</mosaic_0001>

<bundles_post_ra>
// kernel: _imodel_forward_impl.1
= control target key start
LH: loop header
LB: loop body
LE: loop exit
PB: predicated region body
PF: predicated region fallthrough
CT: control target
= control target key end

     0   :  { %s29_s6 = smov [#allocation2]   ;;  %s30_s7 = smov [#allocation3]   ;;  %s48_s0 = inlined_call_operand.hbm [shape: f32[2,4,16,16], index: 0, kind: input, shape index: {}]   ;;  %s49_s1 = inlined_call_operand.hbm [shape: f32[2,4,16,16], index: 1, kind: output, shape index: {}]  }
   0x1   :  { %s31_s8 = smov 0  }
   0x2   :  { %18 = dma.general %s48_s0, 2048, %s49_s1, %s29_s6, %s30_s7, [#allocation4], %s31_s8, 0  }
   0x3   :  { %27 = dma.done.wait [#allocation2], 2048 }
   0x4   :  { %28 = vsyncadd [#allocation2], 4294965248 }

</bundles_post_ra>
